<compile_context>
chip_gen: v7x
topology: tpu7x:2x2x1
jax: 0.10.0
libtpu: 0.0.40
codegen_flags: <defaults>
</compile_context>

<pallas_src>
import jax
import jax.numpy as jnp
from jax import lax
from jax.experimental import pallas as pl
from jax.experimental.pallas import tpu as pltpu


def _round_up(x: int, m: int) -> int:
    return ((x + m - 1) // m) * m


def _make_conv_bn_act_kernel(act_fun: str):
    """Fused (Wscaled @ patches) + shift -> activation kernel body."""

    def kernel(w_ref, p_ref, shift_ref, o_ref):
        # MXU matmul: bf16 [C_out, K] @ bf16 [K, tile] -> f32 [C_out, tile].
        acc = jnp.dot(w_ref[...], p_ref[...], preferred_element_type=jnp.float32)
        # Folded conv-bias + BatchNorm shift (per output channel), f32.
        y = acc + shift_ref[...]
        # Activation epilogue (static choice, traced once).
        if act_fun == "LeakyReLU":
            y = jnp.where(y >= 0, y, 0.2 * y)
        elif act_fun == "ELU":
            y = jnp.where(y >= 0, y, jnp.expm1(jnp.minimum(y, 0.0)))
        elif act_fun == "Swish":
            y = y * jax.nn.sigmoid(y)
        elif act_fun == "none":
            pass
        else:
            raise ValueError(f"unsupported act_fun: {act_fun}")
        o_ref[...] = y.astype(o_ref.dtype)

    return kernel


def downsample_block_forward(
    x,                # [N, C_in, H, W]  (NCHW, like PyTorch)
    weight,           # [C_out, C_in, KH, KW]
    bias,             # [C_out]  (zeros if bias=False)
    gamma,            # [C_out]  BatchNorm weight
    beta,             # [C_out]  BatchNorm bias
    running_mean,     # [C_out]
    running_var,      # [C_out]
    *,
    stride: int = 2,
    pad: str = "zero",
    act_fun: str = "LeakyReLU",
    eps: float = 1e-5,
):
    N, C_in, H, W = x.shape
    C_out, C_in_w, KH, KW = weight.shape
    assert C_in == C_in_w, (C_in, C_in_w)

    # --- padding (matches conv(): zero pad inside Conv2d, or ReflectionPad2d) ---
    to_pad = (KH - 1) // 2
    mode = "reflect" if pad == "reflection" else "constant"
    x_p = jnp.pad(x, ((0, 0), (0, 0), (to_pad, to_pad), (to_pad, to_pad)), mode=mode)
    Hp, Wp = x_p.shape[2], x_p.shape[3]
    H_out = (Hp - KH) // stride + 1
    W_out = (Wp - KW) // stride + 1
    HW = H_out * W_out
    Kdim = C_in * KH * KW

    # --- im2col: [N, Kdim, HW], batch stays leading -> no transposes needed ----
    slices = []
    for kh in range(KH):
        for kw in range(KW):
            slices.append(
                x_p[
                    :, :,
                    kh : kh + stride * (H_out - 1) + 1 : stride,
                    kw : kw + stride * (W_out - 1) + 1 : stride,
                ]
            )
    # [N, C_in, KH*KW, H_out, W_out] -> [N, C_in*KH*KW, H_out*W_out]  (bf16)
    patches = jnp.stack(slices, axis=2).reshape(N, Kdim, HW).astype(jnp.bfloat16)

    # --- fold conv bias + BatchNorm:  scale into weights, shift into epilogue --
    #   bn(conv + b) = (gamma*inv_std)*conv + [gamma*inv_std*(b - mean) + beta]
    inv_std = 1.0 / jnp.sqrt(running_var.astype(jnp.float32) + eps)
    scale = gamma.astype(jnp.float32) * inv_std                       # [C_out]
    shift = (
        beta.astype(jnp.float32)
        + (bias.astype(jnp.float32) - running_mean.astype(jnp.float32)) * scale
    )                                                                 # [C_out]
    w2 = (weight.reshape(C_out, Kdim).astype(jnp.float32) * scale[:, None]).astype(
        jnp.bfloat16
    )

    # --- alignment padding -----------------------------------------------------
    K_pad = _round_up(Kdim, 16)        # bf16 sublane packing on the patches block
    C_out_pad = _round_up(C_out, 8)    # f32 output sublanes
    out_itemsize = jnp.dtype(x.dtype).itemsize

    # --- tile selection against an explicit VMEM working-set budget -------------
    def vmem_working_set(tile):
        return (
            2 * K_pad * tile * 2                 # patches tile, bf16, double buffer
            + 2 * C_out_pad * tile * out_itemsize  # output tile, double buffer
            + 2 * C_out_pad * K_pad * 2            # weights (count 2x to be safe)
            + 2 * C_out_pad * 4                    # shift
        )

    hw128 = _round_up(HW, 128)
    budget = 20 << 20                 # keeps doubled limit <= 48 MiB (v7x-safe)
    tile_hw = 128
    for cand in (4096, 2048, 1024, 512, 256, 128):
        if cand > hw128:
            continue                  # don't pick a tile wider than the problem
        if vmem_working_set(cand) > budget:
            continue
        if _round_up(HW, cand) * 8 > hw128 * 9:
            continue                  # >12.5% padding waste -> try smaller tile
        tile_hw = cand
        break
    HW_pad = _round_up(HW, tile_hw)   # pad up to the tile; sliced off afterwards

    # --- pad operands with zeros (extra channels/K contribute nothing) ----------
    if K_pad != Kdim or HW_pad != HW:
        patches = jnp.pad(patches, ((0, 0), (0, K_pad - Kdim), (0, HW_pad - HW)))
    if K_pad != Kdim or C_out_pad != C_out:
        w2 = jnp.pad(w2, ((0, C_out_pad - C_out), (0, K_pad - Kdim)))
    shift = jnp.pad(shift, (0, C_out_pad - C_out)).reshape(C_out_pad, 1)

    grid = (N, HW_pad // tile_hw)
    vmem_limit = int(min(max(2 * vmem_working_set(tile_hw) + (4 << 20), 32 << 20),
                         48 << 20))

    out = pl.pallas_call(
        _make_conv_bn_act_kernel(act_fun),
        out_shape=jax.ShapeDtypeStruct((N, C_out_pad, HW_pad), x.dtype),
        grid=grid,
        in_specs=[
            pl.BlockSpec((C_out_pad, K_pad), lambda n, m: (0, 0)),      # weights
            pl.BlockSpec((None, K_pad, tile_hw), lambda n, m: (n, 0, m)),  # patches
            pl.BlockSpec((C_out_pad, 1), lambda n, m: (0, 0)),          # shift
        ],
        out_specs=pl.BlockSpec((None, C_out_pad, tile_hw), lambda n, m: (n, 0, m)),
        compiler_params=pltpu.CompilerParams(
            dimension_semantics=("parallel", "parallel"),
            vmem_limit_bytes=vmem_limit,
        ),
    )(w2, patches, shift)

    # Drop channel/lane padding; reshape only (no transpose).
    out = out[:, :C_out, :HW]
    return out.reshape(N, C_out, H_out, W_out)


def _reference_forward(x, weight, bias, gamma, beta, mean, var, *, stride=2,
                       pad="zero", act_fun="LeakyReLU", eps=1e-5):
    """Pure-JAX reference: Conv2d(stride) + eval-mode BN + activation."""
    KH = weight.shape[2]
    to_pad = (KH - 1) // 2
    mode = "reflect" if pad == "reflection" else "constant"
    x_p = jnp.pad(x, ((0, 0), (0, 0), (to_pad, to_pad), (to_pad, to_pad)), mode=mode)
    y = lax.conv_general_dilated(
        x_p, weight, (stride, stride), padding="VALID",
        dimension_numbers=("NCHW", "OIHW", "NCHW"),
        precision=lax.Precision.HIGHEST,
    )
    y = y + bias[None, :, None, None]
    y = (
        gamma[None, :, None, None]
        * (y - mean[None, :, None, None])
        / jnp.sqrt(var[None, :, None, None] + eps)
        + beta[None, :, None, None]
    )
    if act_fun == "LeakyReLU":
        return jnp.where(y >= 0, y, 0.2 * y)
    if act_fun == "ELU":
        return jnp.where(y >= 0, y, jnp.expm1(jnp.minimum(y, 0.0)))
    if act_fun == "Swish":
        return y * jax.nn.sigmoid(y)
    return y


def _run_case(key, *, N, C_in, C_out, H, W, ksize, pad, act_fun):
    ks = jax.random.split(key, 7)
    x = jax.random.normal(ks[0], (N, C_in, H, W), dtype=jnp.float32)
    weight = jax.random.normal(ks[1], (C_out, C_in, ksize, ksize), jnp.float32) * 0.1
    bias = jax.random.normal(ks[2], (C_out,), jnp.float32) * 0.1
    gamma = 1.0 + 0.1 * jax.random.normal(ks[3], (C_out,), jnp.float32)
    beta = 0.1 * jax.random.normal(ks[4], (C_out,), jnp.float32)
    running_mean = 0.1 * jax.random.normal(ks[5], (C_out,), jnp.float32)
    running_var = jax.random.uniform(ks[6], (C_out,), jnp.float32,
                                     minval=0.5, maxval=1.5)

    y = downsample_block_forward(
        x, weight, bias, gamma, beta, running_mean, running_var,
        stride=2, pad=pad, act_fun=act_fun,
    )
    jax.block_until_ready(y)

    y_ref = _reference_forward(
        x, weight, bias, gamma, beta, running_mean, running_var,
        stride=2, pad=pad, act_fun=act_fun,
    )

    assert y.shape == (N, C_out, H // 2, W // 2), (y.shape,)
    assert y.dtype == x.dtype, (y.dtype, x.dtype)
    # bf16 matmul operands -> loosened tolerance vs the f32 reference.
    err = float(jnp.max(jnp.abs(y - y_ref)))
    assert bool(jnp.allclose(y, y_ref, atol=5e-2, rtol=5e-2)), err
    return err


if __name__ == "__main__":
    key = jax.random.PRNGKey(0)
    k1, k2 = jax.random.split(key)

    # Case 1: the module's "small" config (zero pad, LeakyReLU, k=3).
    _run_case(k1, N=2, C_in=4, C_out=8, H=16, W=16, ksize=3,
              pad="zero", act_fun="LeakyReLU")

    # Case 2: exercises C_out / Kdim padding and reflection padding (k=5).
    _run_case(k2, N=1, C_in=8, C_out=12, H=32, W=32, ksize=5,
              pad="reflection", act_fun="LeakyReLU")

    print("KERNEL_OK")
</pallas_src>

<mosaic_0001>
module attributes {stable_mosaic.version = 11 : i64} {
  func.func @kernel(%arg0: i32, %arg1: i32, %arg2: memref<8x48xbf16, #tpu.memory_space<vmem>>, %arg3: memref<1x48x128xbf16, #tpu.memory_space<vmem>>, %arg4: memref<8x1xf32, #tpu.memory_space<vmem>>, %arg5: memref<1x8x128xf32, #tpu.memory_space<vmem>>) attributes {dimension_semantics = [#tpu.dimension_semantics<parallel>, #tpu.dimension_semantics<parallel>], iteration_bounds = array<i64: 2, 1>, scalar_prefetch = 0 : i64, scratch_operands = 0 : i64, tpu.core_type = #tpu.core_type<tc>, window_params = [{pipeline_mode = #tpu.pipeline_mode<synchronous>, transform_indices = @transform_0, window_bounds = array<i64: 8, 48>}, {transform_indices = @transform_1, window_bounds = array<i64: 1, 48, 128>}, {pipeline_mode = #tpu.pipeline_mode<synchronous>, transform_indices = @transform_2, window_bounds = array<i64: 8, 1>}, {transform_indices = @transform_3, window_bounds = array<i64: 1, 8, 128>}]} {
    %c0 = arith.constant 0 : index
    %c0_0 = arith.constant 0 : index
    %0 = vector.load %arg2[%c0, %c0_0] : memref<8x48xbf16, #tpu.memory_space<vmem>>, vector<8x48xbf16>
    %c0_1 = arith.constant 0 : index
    %c0_2 = arith.constant 0 : index
    %c0_3 = arith.constant 0 : index
    %1 = vector.load %arg3[%c0_1, %c0_2, %c0_3] : memref<1x48x128xbf16, #tpu.memory_space<vmem>>, vector<1x48x128xbf16>
    %2 = vector.shape_cast %1 : vector<1x48x128xbf16> to vector<48x128xbf16>
    %cst = arith.constant dense<0.000000e+00> : vector<8x128xf32>
    %3 = tpu.matmul %0, %2, %cst {dimension_numbers = #tpu.dot_dimension_numbers<[1], [0], [0], [1], [0, 0, 1, 1], [], []>} : vector<8x48xbf16>, vector<48x128xbf16>, vector<8x128xf32> -> vector<8x128xf32>
    %c0_4 = arith.constant 0 : index
    %c0_5 = arith.constant 0 : index
    %4 = vector.load %arg4[%c0_4, %c0_5] : memref<8x1xf32, #tpu.memory_space<vmem>>, vector<8x1xf32>
    %5 = vector.broadcast %4 : vector<8x1xf32> to vector<8x128xf32>
    %6 = arith.addf %3, %5 : vector<8x128xf32>
    %cst_6 = arith.constant 0.000000e+00 : f32
    %7 = vector.broadcast %cst_6 : f32 to vector<8x128xf32>
    %8 = arith.cmpf oge, %6, %7 : vector<8x128xf32>
    %cst_7 = arith.constant 2.000000e-01 : f32
    %9 = vector.broadcast %cst_7 : f32 to vector<8x128xf32>
    %10 = arith.mulf %9, %6 : vector<8x128xf32>
    %11 = arith.select %8, %6, %10 : vector<8x128xi1>, vector<8x128xf32>
    %c0_8 = arith.constant 0 : index
    %c0_9 = arith.constant 0 : index
    %c0_10 = arith.constant 0 : index
    %12 = vector.load %arg5[%c0_8, %c0_9, %c0_10] : memref<1x8x128xf32, #tpu.memory_space<vmem>>, vector<1x8x128xf32>
    %13 = vector.shape_cast %12 : vector<1x8x128xf32> to vector<8x128xf32>
    %14 = vector.shape_cast %11 : vector<8x128xf32> to vector<1x8x128xf32>
    tpu.vector_store %arg5[%c0_8, %c0_9, %c0_10], %14 {strides = array<i32>} : memref<1x8x128xf32, #tpu.memory_space<vmem>>, vector<1x8x128xf32>,
    return
  }
  func.func @transform_0(%arg0: i32, %arg1: i32) -> (i32, i32) {
    %c0_i32 = arith.constant 0 : i32
    %c0_i32_0 = arith.constant 0 : i32
    %c0_i32_1 = arith.constant 0 : i32
    return %c0_i32, %c0_i32_0 : i32, i32
  }
  func.func @transform_1(%arg0: i32, %arg1: i32) -> (i32, i32, i32) {
    %c0_i32 = arith.constant 0 : i32
    %c0_i32_0 = arith.constant 0 : i32
    return %arg0, %c0_i32, %arg1 : i32, i32, i32
  }
  func.func @transform_2(%arg0: i32, %arg1: i32) -> (i32, i32) {
    %c0_i32 = arith.constant 0 : i32
    %c0_i32_0 = arith.constant 0 : i32
    %c0_i32_1 = arith.constant 0 : i32
    return %c0_i32, %c0_i32_0 : i32, i32
  }
  func.func @transform_3(%arg0: i32, %arg1: i32) -> (i32, i32, i32) {
    %c0_i32 = arith.constant 0 : i32
    %c0_i32_0 = arith.constant 0 : i32
    return %arg0, %c0_i32, %arg1 : i32, i32, i32
  }
}

</mosaic_0001>

<bundles_post_ra>
// kernel: tpu_custom_call.1
= control target key start
LH: loop header
LB: loop body
LE: loop exit
PB: predicated region body
PF: predicated region fallthrough
CT: control target
= control target key end

     0   :  { %8 = vsyncpa [#allocation3], 0  ;;  %s806_s0 = inlined_call_operand.vmem [shape: bf16[8,48], index: 0, kind: input, shape index: {}]   ;;  %s807_s1 = inlined_call_operand.hbm [shape: bf16[2,48,128], index: 1, kind: input, shape index: {}]   ;;  %s808_s2 = inlined_call_operand.vmem [shape: f32[8,1], index: 2, kind: input, shape index: {}]   ;;  %s809_s3 = inlined_call_operand.hbm [shape: f32[2,8,128], index: 3, kind: output, shape index: {}]  }
   0x1   :  { %10 = vsyncpa [#allocation3 + $0x1], 0 }
   0x2   :  { %11 = vsyncpa [#allocation4], 0 }
   0x3   :  { %13 = vsyncpa [#allocation4 + $0x1], 0  ;;  %s626_s12 = smov 0   ;;  %s628_s13 = smov 0  }
   0x4   :  { %s630_s14 = smov 0   ;;  %s632_s15 = smov 0  }
   0x5   :  { %s634_s16 = smov 0   ;;  %s636_s17 = smov 0  }
   0x6 LB: > { %s382_s18 = sadd.s32 4294967295, %s597_s17   ;;  %s383_s19 = sadd.s32 4294967294, %s597_s17   ;;  %s597_s17 = sphi %s636_s17, %s19_s17   ;;  %s593_s16 = sphi %s634_s16, %s824_s16   ;;  %s589_s15 = sphi %s632_s15, %s823_s15   ;;  %s585_s14 = sphi %s630_s14, %s822_s14   ;;  %s581_s13 = sphi %s628_s13, %s821_s13   ;;  %s577_s12 = sphi %s626_s12, %s820_s12  }
   0x7   : > { %s31_s20 = sadd.s32 1, %s593_s16  ;;  %s61_s21 = sadd.s32 1, %s585_s14 }
   0x8   : > { %p33_p0 = scmp.ge.s32.totalorder %s31_s20, 2  ;;  %p68_p1 = scmp.ne.s32.totalorder %s585_s14, %s581_s13 }
   0x9   : > { %p69_p2 = scmp.eq.s32.totalorder %s597_s17, 0  ;;  %p74_p3 = scmp.ne.s32.totalorder %s581_s13, %s577_s12 }
   0xa   : > { %s826_s20 = smov (%p33_p0, %s31_s20), 0  ;;  %p75_p5 = scmp.eq.s32.totalorder %s382_s18, 0 }
   0xb   : > { %p667_p4 = por %p69_p2, %p68_p1  ;;  %s56_s23 = ssub.s32 %s593_s16, %s826_s20 }
   0xc   : > { %p121_p6 = scmp.eq.s32.totalorder %s382_s18, 1  ;;  %p59_p7 = scmp.eq.s32.totalorder %s56_s23, 0 }
   0xd   : > { %p673_p8 = por %p75_p5, %p74_p3  ;;  %p127_p10 = scmp.eq.s32.totalorder %s383_s19, 1 }
   0xe   : > { %p677_p9 = por %p121_p6, %p68_p1  ;;  %p426_p13 = scmp.lt.s32.totalorder %s597_s17, 2 }
   0xf   : > { %s682_s26 = scalar_select %p59_p7, %s585_s14, %s61_s21  }
  0x10   : > { %s813_s25 = scalar_select %p677_p9, 1, 0 }
  0x11   : > { %p684_p11 = por %p127_p10, %p74_p3  ;;  %s153_s28 = sand.u32 1, %s585_s14  }
  0x12   : > { %s411_s29 = smul.u32 24, %s153_s28  ;;  %p694_p0 = pnand %p426_p13, %p667_p4 }
  0x13   : > { %s814_s27 = scalar_select %p684_p11, 1, 0 }
  0x14   : > { %s412_s30 = smul.u32 384, %s593_s16  ;;  %s157_s8 = scalar_lea.vmem [#allocation2], %s411_s29 }
  0x15   : > { %s165_s9 = sshll.u32 %s157_s8, 4  ;;  %s706_s10 = scalar_lea.sflag [#allocation3], %s153_s28  ;;  %s703_s9 = int_to_ptr.vmem [resolvable:$true] %s165_s9 }
  0x16   : > { %s701_s7 = scalar_lea.hbm %s807_s1, %s412_s30  ;;  %p487_p3 = pneg %p694_p0 }
  0x17   : > { %s485_s11 = scalar_lea.hbm %s701_s7, 384  ;;  %s490_s21 = scalar_lea.hbm %s807_s1, 768 }
  0x18   : > { %p486_p2 = scmp.ne.s32.totalorder %s701_s7, %s485_s11  ;;  %p491_p6 = scmp.lt.u32.totalorder %s701_s7, %s807_s1 }
  0x19   : > { %p492_p7 = scmp.lt.u32.totalorder %s490_s21, %s485_s11  ;;  %p494_p13 = scmp.lt.u32.totalorder %s485_s11, %s701_s7 }
  0x1a   : > { %p488_p4 = pnand %p487_p3, %p486_p2 }
  0x1b   : > { %p493_p10 = por %p492_p7, %p491_p6 }
  0x1c   : > { %p489_p5 = pneg %p488_p4 }
  0x1d   : > { %p495_p12 = por %p494_p13, %p493_p10 }
  0x1f   : > { %p496_p1 = pnand %p495_p12, %p489_p5 }
  0x21   : > { %499 = shalt.err (!%p496_p1)
}
  0x22   : > { %s500_s28 = scalar_lea.vmem %s703_s9, 384  ;;  %s599_s29 = smov [#allocation2]  }
  0x23   : > { %p501_p2 = scmp.ne.s32.totalorder %s703_s9, %s500_s28  ;;  %s505_s30 = sshll.u32 %s599_s29, 4  ;;  %s506_s30 = int_to_ptr.vmem [resolvable:$false] %s505_s30 }
  0x24   : > { %s507_s5 = scalar_lea.vmem %s506_s30, 768  ;;  %p508_p9 = scmp.lt.s32.totalorder %s703_s9, %s506_s30 }
  0x25   : > { %p503_p4 = pnand %p501_p2, %p487_p3  ;;  %p509_p6 = scmp.lt.s32.totalorder %s507_s5, %s500_s28 }
  0x27   : > { %p504_p11 = pneg %p503_p4  ;;  %p510_p7 = por %p509_p6, %p508_p9 }
  0x29   : > { %p511_p10 = pnand %p510_p7, %p504_p11 }
  0x2b   : > { %514 = shalt.err (!%p511_p10)
}
  0x2c   : > { %s600_s6 = smov 64   ;;  %s601_s8 = smov 4  }
  0x2d   : > { %421 = dma.hbm_to_vmem [thread:$0]  (!%p694_p0), %s701_s7, 384, %s703_s9, %s706_s10, %s600_s6, %s600_s6, %s601_s8  }
  0x2e   : > { %p173_p12 = scmp.lt.s32.totalorder %s597_s17, 3  ;;  %p816_p1 = scmp.ge.s32.totalorder %s597_s17, 1 }
  0x30   : > { %p174_p3 = pnand %p816_p1, %p173_p12 }
  0x31   : > { %s738_s11 = sand.u32 (!%p174_p3), 1, %s581_s13  }
  0x32   : > { %177 = sbr.rel (%p174_p3) target bundleno = 302 (0x12e), region = 32  ;;  %s180_s19 = scalar_lea.sflag (!%p174_p3), [#allocation3], %s738_s11 }
  0x33   : > { %s413_s18 = smul.u32 (!%p174_p3), 24, %s738_s11 }
  0x35   : > { %s183_s21 = scalar_lea.vmem (!%p174_p3), [#allocation2], %s413_s18 }
  0x39   : > { %568 = dma.done.wait (%p673_p8), %s180_s19, 384  }
  0x3a   : > { %570 = vsyncadd (%p673_p8), %s180_s19, 4294966912  ;;  %v602_v0 = vmov 0.0   ;;  %vm603_vm0 = vmmov 0   ;;  %v604_v1 = vmov 0   ;;  %v482_v2 = vld [vmem:[%s183_s21] sm:$0xff]   ;;  %v483_v3 = vld [vmem:[%s183_s21 + $0x8] sm:$0xff]  }
  0x3b   : > { %401 = vmatprep.subr.bf16.mxu0 %v602_v0  ;;  %407 = vmatprep.mubr.msk.bf16.mxu0 %vm603_vm0, %v602_v0  ;;  %v214_v4 = vld [vmem:[%s808_s2] sm:$0xff]  ;;  %v484_v5 = vld [vmem:[%s183_s21 + $0x10] sm:$0xff]   ;;  %vm238_vm1 = vcmask 392192   ;;  %s388_s10 = sshll.u32 %s738_s11, 3  ;;  %s394_s22 = sshll.u32 %s589_s15, 7 }
  0x3c   : > { %481 = vset.pattern.permute.xlu0 %v604_v1  ;;  %402 = vmatpush3.bf16.msra.mxu0 %v482_v2  ;;  %v207_v6 = vld [vmem:[%s806_s0] sm:$0xf]  ;;  %s205_s23 = scalar_lea.vmem [#allocation5], %s388_s10  ;;  %s757_s5 = scalar_lea.hbm %s809_s3, %s394_s22 }
  0x3d   : > { %403 = vmatprep.subr.bf16.mxu0 %v602_v0  ;;  %217 = vperm.xlu0 %481, %v214_v4   ;;  %s301_s28 = sshll.u32 %s205_s23, 4  ;;  %s287_s6 = scalar_lea.sflag [#allocation4], %s738_s11  ;;  %s759_s28 = int_to_ptr.vmem [resolvable:$true] %s301_s28 }
  0x3e   : > { %s515_s15 = scalar_lea.vmem %s759_s28, 128  ;;  %p817_p9 = scmp.ne.s32.totalorder %s813_s25, 0 }
  0x3f   : > { %p516_p8 = scmp.ne.s32.totalorder %s759_s28, %s515_s15  ;;  %s605_s8 = smov [#allocation5]  }
  0x40   : > { %404 = vmatpush3.bf16.msra.mxu0 %v483_v3  ;;  %s519_s18 = sshll.u32 %s605_s8, 4  ;;  %s520_s18 = int_to_ptr.vmem [resolvable:$false] %s519_s18 }
  0x41   : > { %405 = vmatprep.subr.bf16.mxu0 %v602_v0  ;;  %p517_p11 = pnand %p516_p8, %p817_p9  ;;  %s521_s19 = scalar_lea.vmem %s520_s18, 256 }
  0x42   : > { %p522_p5 = scmp.lt.s32.totalorder %s759_s28, %s520_s18  ;;  %p523_p13 = scmp.lt.s32.totalorder %s521_s19, %s515_s15 }
  0x43   : > { %p518_p0 = pneg %p517_p11 }
  0x44   : > { %406 = vmatpush3.bf16.msra.mxu0 %v484_v5  ;;  %p524_p2 = por %p523_p13, %p522_p5 }
  0x46   : > { %p525_p4 = pnand %p524_p2, %p518_p0 }
  0x47   : > { %408 = vmatmul.mubr.msk.bf16.vlgmr.msra.gmra.mrb[0].mxu0 %vm238_vm1, %v207_v6 }
  0xbc   : > { %v218_v7 = vpop.permute.xlu0 %217 }
 0x11a   : > { %v276_v8 = vpop.f32.mrb[0].mxu0 }
 0x11b   : > { %v277_v9 = vadd.f32 %v276_v8, %v218_v7  ;;  %v409_v10 = vpop.f32.mrb[1].mxu0 }
 0x11c   : > { %v279_v11 = vpop.f32.mrb[2].mxu0 }
 0x11d   : > { %vm282_vm2 = vcmp.ge.f32.partialorder %v277_v9, 0.0  ;;  %v283_v12 = vmul.f32 0.2, %v277_v9  ;;  %v410_v13 = vpop.f32.mrb[3].mxu0 }
 0x11f   : > { %v284_v14 = vsel %vm282_vm2, %v277_v9, %v283_v12 }
 0x120   : > { %285 = vst [vmem:[%s205_s23] sm:$0xff] %v284_v14 }
 0x121   : > { %528 = shalt.err (!%p525_p4)
}
 0x122   : > { %s529_s11 = scalar_lea.hbm %s757_s5, 128  ;;  %s533_s7 = scalar_lea.hbm %s809_s3, 256 }
 0x123   : > { %p530_p6 = scmp.ne.s32.totalorder %s757_s5, %s529_s11  ;;  %p534_p12 = scmp.lt.u32.totalorder %s757_s5, %s809_s3 }
 0x124   : > { %p535_p1 = scmp.lt.u32.totalorder %s533_s7, %s529_s11  ;;  %p537_p8 = scmp.lt.u32.totalorder %s529_s11, %s757_s5 }
 0x125   : > { %p531_p7 = pnand %p530_p6, %p817_p9 }
 0x126   : > { %p536_p3 = por %p535_p1, %p534_p12 }
 0x127   : > { %p532_p10 = pneg %p531_p7 }
 0x128   : > { %p538_p11 = por %p537_p8, %p536_p3 }
 0x12a   : > { %p539_p0 = pnand %p538_p11, %p532_p10 }
 0x12c   : > { %542 = shalt.err (!%p539_p0)
}
 0x12d   : > { %416 = dma.vmem_to_hbm [thread:$0]  (%p817_p9), %s759_s28, 128, %s757_s5, %s287_s6  }
 0x12e PF: > { %s313_s10 = sand.u32 1, %s577_s12   ;;  %p818_p5 = scmp.ne.s32.totalorder %s814_s27, 0 }
 0x12f   : > { %p819_p13 = scmp.ge.s32.totalorder %s597_s17, 2  ;;  %s314_s22 = scalar_lea.sflag [#allocation4], %s313_s10 }
 0x131   : > { %p423_p2 = pnand %p819_p13, %p818_p5 }
 0x133   : > { %572 = dma.done.wait (!%p423_p2), %s314_s22, 128  }
 0x134   : > { %574 = vsyncadd (!%p423_p2), %s314_s22, 4294967168  ;;  %s19_s17 = sadd.s32 1, %s597_s17   ;;  %s820_s12 = smov %s581_s13 }
 0x135   : > { %p16_p4 = scmp.ge.s32.totalorder %s19_s17, 4   ;;  %s821_s13 = smov %s585_s14 }
 0x136   : > { %s822_s14 = smov %s682_s26  ;;  %s823_s15 = smov %s593_s16 }
 0x137   : > { %s824_s16 = smov %s826_s20  ;;  %18 = sbr.rel (!%p16_p4) target bundleno = 6 (0x6), region = 77 }
 0x13e   :  { %319 = vsyncpa [#allocation3], 1 }
 0x13f   :  { %321 = vsyncpa [#allocation3 + $0x1], 1 }
 0x140   :  { %322 = vsyncpa [#allocation4], 1 }
 0x141   :  { %324 = vsyncpa [#allocation4 + $0x1], 1 }

</bundles_post_ra>
